<compile_context>
chip_gen: v7x
topology: tpu7x:2x2x1
jax: 0.10.0
libtpu: 0.0.40
codegen_flags: <defaults>
</compile_context>

<pallas_src>
import functools
import math

import jax
import jax.numpy as jnp
from jax.experimental import pallas as pl
from jax.experimental.pallas import tpu as pltpu


def _round_up(v, m):
    return ((v + m - 1) // m) * m


def _gin_kernel(a_ref, xall_ref, xi_ref, w_ref, b_ref, o_ref, acc_ref, *, eps, tk):
    k = pl.program_id(1)
    nk = pl.num_programs(1)

    @pl.when(k == 0)
    def _():
        acc_ref[...] = jnp.zeros_like(acc_ref)

    # Aggregation partial sum: A[i-tile, k-tile] @ x[k-tile]  (bf16 MXU, f32 acc).
    start = pl.multiple_of(k * tk, tk)
    xk = xall_ref[pl.ds(start, tk), :]                                  # (tk, Fp_in) bf16
    acc_ref[...] += jnp.dot(a_ref[...], xk, preferred_element_type=jnp.float32)

    @pl.when(k == nk - 1)
    def _():
        # GIN update input in f32: (1+eps)*x + aggregated
        h = (1.0 + eps) * xi_ref[...] + acc_ref[...]                    # (tm, Fp_in) f32
        # Linear on the bf16 MXU path, f32 accumulation, f32 bias + ReLU.
        out = jnp.dot(h.astype(jnp.bfloat16), w_ref[...],
                      preferred_element_type=jnp.float32) + b_ref[...]
        o_ref[...] = jnp.maximum(out, 0.0).astype(o_ref.dtype)


def gin_layer_forward(x, edge_index, weight, bias, *, eps=0.0, tm=256, tk=256):
    """x: (N, F_in) f32, edge_index: (2, E) int32 with row0=dst, row1=src,
    weight: (F_out, F_in) (PyTorch nn.Linear layout), bias: (F_out,)."""
    n, f_in = x.shape
    f_out = weight.shape[0]

    # Glue: dense adjacency A[dst, src] += 1 (duplicate edges accumulate), matching
    # torch scatter_add_.  Build in f32 then cast to bf16 (exact for counts <= 256).
    adj = jnp.zeros((n, n), jnp.float32).at[edge_index[0], edge_index[1]].add(1.0)

    # Padded, lane-dense / MXU-friendly shapes.
    n_p = _round_up(n, math.lcm(tm, tk))
    fpi = _round_up(f_in, 128)
    fpo = _round_up(f_out, 128)

    adj_p = jnp.zeros((n_p, n_p), jnp.bfloat16).at[:n, :n].set(adj.astype(jnp.bfloat16))
    x_f32 = jnp.zeros((n_p, fpi), jnp.float32).at[:n, :f_in].set(x.astype(jnp.float32))
    x_bf16 = x_f32.astype(jnp.bfloat16)
    w_p = jnp.zeros((fpi, fpo), jnp.bfloat16).at[:f_in, :f_out].set(
        weight.T.astype(jnp.bfloat16))
    b_p = jnp.zeros((1, fpo), jnp.float32).at[0, :f_out].set(bias.astype(jnp.float32))

    grid = (n_p // tm, n_p // tk)
    kernel = functools.partial(_gin_kernel, eps=float(eps), tk=tk)

    flops = 2 * n_p * n_p * fpi + 2 * n_p * fpi * fpo
    bytes_accessed = (adj_p.size * 2 + x_bf16.size * 2 + x_f32.size * 4
                      + w_p.size * 2 + b_p.size * 4 + n_p * fpo * 4)

    out_p = pl.pallas_call(
        kernel,
        out_shape=jax.ShapeDtypeStruct((n_p, fpo), jnp.float32),
        grid_spec=pltpu.PrefetchScalarGridSpec(
            num_scalar_prefetch=0,
            grid=grid,
            in_specs=[
                # Streaming, byte-dominant operand: bf16 adjacency tiles.
                pl.BlockSpec((tm, tk), lambda i, k: (i, k)),
                # Full x (bf16) resident in VMEM across the whole grid.
                pl.BlockSpec((n_p, fpi), lambda i, k: (0, 0)),
                # Row tile of x in f32 for the (1+eps)*x term (changes only with i).
                pl.BlockSpec((tm, fpi), lambda i, k: (i, 0)),
                # W^T and bias resident (constant index map -> DMA'd once).
                pl.BlockSpec((fpi, fpo), lambda i, k: (0, 0)),
                pl.BlockSpec((1, fpo), lambda i, k: (0, 0)),
            ],
            out_specs=pl.BlockSpec((tm, fpo), lambda i, k: (i, 0)),
            scratch_shapes=[pltpu.VMEM((tm, fpi), jnp.float32)],
        ),
        compiler_params=pltpu.CompilerParams(
            dimension_semantics=("parallel", "arbitrary")),
        cost_estimate=pl.CostEstimate(
            flops=flops, transcendentals=0, bytes_accessed=bytes_accessed),
    )(adj_p, x_bf16, x_f32, w_p, b_p)

    return out_p[:n, :f_out]


def _reference(x, edge_index, weight, bias, eps=0.0):
    n = x.shape[0]
    adj = jnp.zeros((n, n), jnp.float32).at[edge_index[0], edge_index[1]].add(1.0)
    agg = adj @ x
    h = (1.0 + eps) * x + agg
    return jax.nn.relu(h @ weight.T + bias)


if __name__ == "__main__":
    key = jax.random.PRNGKey(0)
    k_x, k_w, k_b = jax.random.split(key, 3)

    # Small graph: N=16 nodes, F_in=8, F_out=16
    N, F_IN, F_OUT = 16, 8, 16
    x = jax.random.normal(k_x, (N, F_IN), dtype=jnp.float32)

    # Deterministic edge set: bidirectional ring + a couple of chords.
    src = jnp.arange(N, dtype=jnp.int32)
    dst = (src + 1) % N
    edge_index = jnp.stack([
        jnp.concatenate([dst, src, jnp.array([0, 5], jnp.int32)]),   # row 0 = target
        jnp.concatenate([src, dst, jnp.array([8, 12], jnp.int32)]),  # row 1 = source
    ], axis=0)

    # nn.Linear(in_features, out_features)-style deterministic init.
    bound = 1.0 / jnp.sqrt(jnp.float32(F_IN))
    weight = jax.random.uniform(k_w, (F_OUT, F_IN), jnp.float32, -bound, bound)
    bias = jax.random.uniform(k_b, (F_OUT,), jnp.float32, -bound, bound)

    out = gin_layer_forward(x, edge_index, weight, bias, eps=0.0)
    out = jax.block_until_ready(out)

    ref = _reference(x, edge_index, weight, bias, eps=0.0)
    assert out.shape == (N, F_OUT)
    # bf16 matmul inputs (f32 accumulation) => loose-ish but tight-enough tolerance.
    assert jnp.allclose(out, ref, atol=5e-2, rtol=5e-2), "mismatch vs reference"

    print("KERNEL_OK")
</pallas_src>

<mosaic_0001>
module attributes {stable_mosaic.version = 11 : i64} {
  func.func @_gin_kernel(%arg0: i32, %arg1: i32, %arg2: memref<256x256xbf16, #tpu.memory_space<vmem>>, %arg3: memref<256x128xbf16, #tpu.memory_space<vmem>>, %arg4: memref<256x128xf32, #tpu.memory_space<vmem>>, %arg5: memref<128x128xbf16, #tpu.memory_space<vmem>>, %arg6: memref<1x128xf32, #tpu.memory_space<vmem>>, %arg7: memref<256x128xf32, #tpu.memory_space<vmem>>, %arg8: memref<256x128xf32, #tpu.memory_space<vmem>>) attributes {dimension_semantics = [#tpu.dimension_semantics<parallel>, #tpu.dimension_semantics<arbitrary>], iteration_bounds = array<i64: 1, 1>, scalar_prefetch = 0 : i64, scratch_operands = 1 : i64, tpu.core_type = #tpu.core_type<tc>, window_params = [{transform_indices = @transform_0, window_bounds = array<i64: 256, 256>}, {pipeline_mode = #tpu.pipeline_mode<synchronous>, transform_indices = @transform_1, window_bounds = array<i64: 256, 128>}, {transform_indices = @transform_2, window_bounds = array<i64: 256, 128>}, {pipeline_mode = #tpu.pipeline_mode<synchronous>, transform_indices = @transform_3, window_bounds = array<i64: 128, 128>}, {pipeline_mode = #tpu.pipeline_mode<synchronous>, transform_indices = @transform_4, window_bounds = array<i64: 1, 128>}, {transform_indices = @transform_5, window_bounds = array<i64: 256, 128>}]} {
    %c0_i32 = arith.constant 0 : i32
    %0 = arith.cmpi eq, %arg1, %c0_i32 : i32
    %1 = arith.extui %0 : i1 to i32
    %c0_i32_0 = arith.constant 0 : i32
    %2 = arith.cmpi ne, %1, %c0_i32_0 : i32
    scf.if %2 {
      %cst_9 = arith.constant 0.000000e+00 : f32
      %15 = vector.broadcast %cst_9 : f32 to vector<256x128xf32>
      %c0_10 = arith.constant 0 : index
      %c0_11 = arith.constant 0 : index
      %16 = vector.load %arg8[%c0_10, %c0_11] : memref<256x128xf32, #tpu.memory_space<vmem>>, vector<256x128xf32>
      tpu.vector_store %arg8[%c0_10, %c0_11], %15 {strides = array<i32>} : memref<256x128xf32, #tpu.memory_space<vmem>>, vector<256x128xf32>,
    } else {
    }
    %c256_i32 = arith.constant 256 : i32
    %3 = arith.muli %arg1, %c256_i32 : i32
    %4 = tpu.assume_multiple %3, 256 : i32
    %5 = arith.index_cast %4 : i32 to index
    %c0 = arith.constant 0 : index
    %6 = vector.load %arg3[%5, %c0] : memref<256x128xbf16, #tpu.memory_space<vmem>>, vector<256x128xbf16>
    %c0_1 = arith.constant 0 : index
    %c0_2 = arith.constant 0 : index
    %7 = vector.load %arg8[%c0_1, %c0_2] : memref<256x128xf32, #tpu.memory_space<vmem>>, vector<256x128xf32>
    %c0_3 = arith.constant 0 : index
    %c0_4 = arith.constant 0 : index
    %8 = vector.load %arg2[%c0_3, %c0_4] : memref<256x256xbf16, #tpu.memory_space<vmem>>, vector<256x256xbf16>
    %cst = arith.constant dense<0.000000e+00> : vector<256x128xf32>
    %9 = tpu.matmul %8, %6, %cst {dimension_numbers = #tpu.dot_dimension_numbers<[1], [0], [0], [1], [0, 0, 1, 1], [], []>} : vector<256x256xbf16>, vector<256x128xbf16>, vector<256x128xf32> -> vector<256x128xf32>
    %10 = arith.addf %7, %9 : vector<256x128xf32>
    %c0_5 = arith.constant 0 : index
    %c0_6 = arith.constant 0 : index
    %11 = vector.load %arg8[%c0_5, %c0_6] : memref<256x128xf32, #tpu.memory_space<vmem>>, vector<256x128xf32>
    tpu.vector_store %arg8[%c0_5, %c0_6], %10 {strides = array<i32>} : memref<256x128xf32, #tpu.memory_space<vmem>>, vector<256x128xf32>,
    %c0_i32_7 = arith.constant 0 : i32
    %12 = arith.cmpi eq, %arg1, %c0_i32_7 : i32
    %13 = arith.extui %12 : i1 to i32
    %c0_i32_8 = arith.constant 0 : i32
    %14 = arith.cmpi ne, %13, %c0_i32_8 : i32
    scf.if %14 {
      %c0_9 = arith.constant 0 : index
      %c0_10 = arith.constant 0 : index
      %15 = vector.load %arg4[%c0_9, %c0_10] : memref<256x128xf32, #tpu.memory_space<vmem>>, vector<256x128xf32>
      %cst_11 = arith.constant 1.000000e+00 : f32
      %16 = vector.broadcast %cst_11 : f32 to vector<256x128xf32>
      %17 = arith.mulf %16, %15 : vector<256x128xf32>
      %c0_12 = arith.constant 0 : index
      %c0_13 = arith.constant 0 : index
      %18 = vector.load %arg8[%c0_12, %c0_13] : memref<256x128xf32, #tpu.memory_space<vmem>>, vector<256x128xf32>
      %19 = arith.addf %17, %18 : vector<256x128xf32>
      %20 = arith.truncf %19 : vector<256x128xf32> to vector<256x128xbf16>
      %c0_14 = arith.constant 0 : index
      %c0_15 = arith.constant 0 : index
      %21 = vector.load %arg5[%c0_14, %c0_15] : memref<128x128xbf16, #tpu.memory_space<vmem>>, vector<128x128xbf16>
      %cst_16 = arith.constant dense<0.000000e+00> : vector<256x128xf32>
      %22 = tpu.matmul %20, %21, %cst_16 {dimension_numbers = #tpu.dot_dimension_numbers<[1], [0], [0], [1], [0, 0, 1, 1], [], []>} : vector<256x128xbf16>, vector<128x128xbf16>, vector<256x128xf32> -> vector<256x128xf32>
      %c0_17 = arith.constant 0 : index
      %c0_18 = arith.constant 0 : index
      %23 = vector.load %arg6[%c0_17, %c0_18] : memref<1x128xf32, #tpu.memory_space<vmem>>, vector<1x128xf32>
      %24 = vector.broadcast %23 : vector<1x128xf32> to vector<256x128xf32>
      %25 = arith.addf %22, %24 : vector<256x128xf32>
      %cst_19 = arith.constant 0.000000e+00 : f32
      %26 = vector.broadcast %cst_19 : f32 to vector<256x128xf32>
      %27 = arith.maximumf %25, %26 : vector<256x128xf32>
      %c0_20 = arith.constant 0 : index
      %c0_21 = arith.constant 0 : index
      %28 = vector.load %arg7[%c0_20, %c0_21] : memref<256x128xf32, #tpu.memory_space<vmem>>, vector<256x128xf32>
      tpu.vector_store %arg7[%c0_20, %c0_21], %27 {strides = array<i32>} : memref<256x128xf32, #tpu.memory_space<vmem>>, vector<256x128xf32>,
    } else {
    }
    return
  }
  func.func @transform_0(%arg0: i32, %arg1: i32) -> (i32, i32) {
    %c0_i32 = arith.constant 0 : i32
    return %arg0, %arg1 : i32, i32
  }
  func.func @transform_1(%arg0: i32, %arg1: i32) -> (i32, i32) {
    %c0_i32 = arith.constant 0 : i32
    %c0_i32_0 = arith.constant 0 : i32
    %c0_i32_1 = arith.constant 0 : i32
    return %c0_i32, %c0_i32_0 : i32, i32
  }
  func.func @transform_2(%arg0: i32, %arg1: i32) -> (i32, i32) {
    %c0_i32 = arith.constant 0 : i32
    %c0_i32_0 = arith.constant 0 : i32
    return %arg0, %c0_i32 : i32, i32
  }
  func.func @transform_3(%arg0: i32, %arg1: i32) -> (i32, i32) {
    %c0_i32 = arith.constant 0 : i32
    %c0_i32_0 = arith.constant 0 : i32
    %c0_i32_1 = arith.constant 0 : i32
    return %c0_i32, %c0_i32_0 : i32, i32
  }
  func.func @transform_4(%arg0: i32, %arg1: i32) -> (i32, i32) {
    %c0_i32 = arith.constant 0 : i32
    %c0_i32_0 = arith.constant 0 : i32
    %c0_i32_1 = arith.constant 0 : i32
    return %c0_i32, %c0_i32_0 : i32, i32
  }
  func.func @transform_5(%arg0: i32, %arg1: i32) -> (i32, i32) {
    %c0_i32 = arith.constant 0 : i32
    %c0_i32_0 = arith.constant 0 : i32
    return %arg0, %c0_i32 : i32, i32
  }
}

</mosaic_0001>

<bundles_post_ra>
// kernel: tpu_custom_call.1
= control target key start
LH: loop header
LB: loop body
LE: loop exit
PB: predicated region body
PF: predicated region fallthrough
CT: control target
= control target key end

     0   :  { %10 = vsyncpa [#allocation4], 0  ;;  %s1777_s0 = inlined_call_operand.hbm [shape: bf16[256,256], index: 0, kind: input, shape index: {}]   ;;  %s1778_s1 = inlined_call_operand.hbm [shape: bf16[256,128], index: 1, kind: input, shape index: {}]   ;;  %s1779_s2 = inlined_call_operand.hbm [shape: f32[256,128], index: 2, kind: input, shape index: {}]   ;;  %s1780_s3 = inlined_call_operand.hbm [shape: bf16[128,128], index: 3, kind: input, shape index: {}]   ;;  %s1781_s4 = inlined_call_operand.vmem [shape: f32[1,128], index: 4, kind: input, shape index: {}]   ;;  %s1782_s5 = inlined_call_operand.hbm [shape: f32[256,128], index: 5, kind: output, shape index: {}]  }
   0x1   :  { %11 = vsyncpa [#allocation7], 0 }
   0x2   :  { %12 = vsyncpa [#allocation10], 0 }
   0x3   :  { %13 = vsyncpa [#allocation5], 0  ;;  %s1583_s18 = smov [#allocation6]   ;;  %s1465_s22 = scalar_lea.hbm %s1778_s1, 2048 }
   0x4   :  { %s31_s19 = sshll.u32 %s1583_s18, 4  ;;  %p1466_p0 = scmp.ne.s32.totalorder %s1778_s1, %s1465_s22  ;;  %s32_s19 = int_to_ptr.vmem [resolvable:$true] %s31_s19 }
   0x5   :  { %p1469_p1 = scmp.lt.u32.totalorder %s1465_s22, %s1778_s1 }
   0x7   :  { %p1471_p2 = pnand %p1469_p1, %p1466_p0 }
   0x9   :  { %1474 = shalt.err (!%p1471_p2)
}
   0xa   :  { %s1475_s27 = scalar_lea.vmem %s32_s19, 2048  ;;  %p1480_p4 = scmp.lt.s32.totalorder %s32_s19, %s32_s19 }
   0xb   :  { %p1476_p3 = scmp.ne.s32.totalorder %s32_s19, %s1475_s27  ;;  %p1481_p5 = scmp.lt.s32.totalorder %s1475_s27, %s1475_s27 }
   0xd   :  { %p1482_p6 = por %p1481_p5, %p1480_p4 }
   0xf   :  { %p1483_p7 = pnand %p1482_p6, %p1476_p3 }
  0x11   :  { %1486 = shalt.err (!%p1483_p7)
}
  0x12   :  { %s1584_s28 = smov 64   ;;  %s1585_s29 = smov 4  }
  0x13   :  { %37 = dma.hbm_to_vmem [thread:$0]  %s1778_s1, 2048, %s32_s19, [#allocation7], %s1584_s28, %s1584_s28, %s1585_s29  }
  0x14   :  { %s1586_s7 = smov [#allocation3]   ;;  %s1487_s11 = scalar_lea.hbm %s1777_s0, 4096 }
  0x15   :  { %s19_s8 = sshll.u32 %s1586_s7, 4  ;;  %p1488_p8 = scmp.ne.s32.totalorder %s1777_s0, %s1487_s11  ;;  %s20_s8 = int_to_ptr.vmem [resolvable:$true] %s19_s8 }
  0x16   :  { %p1491_p9 = scmp.lt.u32.totalorder %s1487_s11, %s1777_s0 }
  0x18   :  { %p1493_p10 = pnand %p1491_p9, %p1488_p8 }
  0x1a   :  { %1496 = shalt.err (!%p1493_p10)
}
  0x1b   :  { %s1497_s16 = scalar_lea.vmem %s20_s8, 4096  ;;  %p1502_p12 = scmp.lt.s32.totalorder %s20_s8, %s20_s8 }
  0x1c   :  { %p1498_p11 = scmp.ne.s32.totalorder %s20_s8, %s1497_s16  ;;  %p1503_p13 = scmp.lt.s32.totalorder %s1497_s16, %s1497_s16 }
  0x1e   :  { %p1504_p0 = por %p1503_p13, %p1502_p12 }
  0x20   :  { %p1505_p1 = pnand %p1504_p0, %p1498_p11 }
  0x22   :  { %1508 = shalt.err (!%p1505_p1)
}
  0x23   :  { %s1587_s1 = smov 128   ;;  %s1588_s17 = smov 8  }
  0x24   :  { %25 = dma.hbm_to_vmem [thread:$0]  %s1777_s0, 4096, %s20_s8, [#allocation4], %s1587_s1, %s1587_s1, %s1588_s17  }
  0x25   :  { %s1589_s20 = smov [#allocation8]   ;;  %s1590_s22 = smov [#allocation9]  }
  0x26   :  { %s43_s21 = sshll.u32 %s1589_s20, 4  ;;  %s55_s23 = sshll.u32 %s1590_s22, 4  ;;  %s44_s21 = int_to_ptr.vmem [resolvable:$true] %s43_s21  ;;  %s1652_s23 = int_to_ptr.vmem [resolvable:$true] %s55_s23 }
  0x27   :  { %s1509_s26 = scalar_lea.hbm %s1779_s2, 4096 }
  0x28   :  { %p1510_p2 = scmp.ne.s32.totalorder %s1779_s2, %s1509_s26  ;;  %p1513_p3 = scmp.lt.u32.totalorder %s1509_s26, %s1779_s2 }
  0x2a   :  { %p1515_p4 = pnand %p1513_p3, %p1510_p2 }
  0x2c   :  { %1518 = shalt.err (!%p1515_p4)
}
  0x2d   :  { %s1519_s0 = scalar_lea.vmem %s44_s21, 4096  ;;  %p1524_p6 = scmp.lt.s32.totalorder %s44_s21, %s44_s21 }
  0x2e   :  { %p1520_p5 = scmp.ne.s32.totalorder %s44_s21, %s1519_s0  ;;  %p1525_p7 = scmp.lt.s32.totalorder %s1519_s0, %s1519_s0 }
  0x30   :  { %p1526_p8 = por %p1525_p7, %p1524_p6 }
  0x32   :  { %p1527_p9 = pnand %p1526_p8, %p1520_p5 }
  0x34   :  { %1530 = shalt.err (!%p1527_p9)
}
  0x35   :  { %49 = dma.hbm_to_vmem [thread:$0]  %s1779_s2, 4096, %s44_s21, [#allocation7], %s1587_s1, %s1587_s1, %s1588_s17  }
  0x36   :  { %s1531_s12 = scalar_lea.hbm %s1780_s3, 1024 }
  0x37   :  { %p1532_p10 = scmp.ne.s32.totalorder %s1780_s3, %s1531_s12  ;;  %p1535_p11 = scmp.lt.u32.totalorder %s1531_s12, %s1780_s3 }
  0x39   :  { %p1537_p12 = pnand %p1535_p11, %p1532_p10 }
  0x3b   :  { %1540 = shalt.err (!%p1537_p12)
}
  0x3c   :  { %s1541_s18 = scalar_lea.vmem %s1652_s23, 1024  ;;  %p1546_p0 = scmp.lt.s32.totalorder %s1652_s23, %s1652_s23 }
  0x3d   :  { %p1542_p13 = scmp.ne.s32.totalorder %s1652_s23, %s1541_s18  ;;  %p1547_p1 = scmp.lt.s32.totalorder %s1541_s18, %s1541_s18 }
  0x3f   :  { %p1548_p2 = por %p1547_p1, %p1546_p0 }
  0x41   :  { %p1549_p3 = pnand %p1548_p2, %p1542_p13 }
  0x43   :  { %1552 = shalt.err (!%p1549_p3)
}
  0x44   :  { %61 = dma.hbm_to_vmem [thread:$0]  %s1780_s3, 1024, %s1652_s23, [#allocation10], %s1584_s28, %s1584_s28, %s1585_s29  }
  0x45   :  { %1575 = dma.done.wait [#allocation4], 4096  }
  0x46   :  { %1576 = vsyncadd [#allocation4], 4294963200 }
  0x47   :  { %1577 = dma.done.wait [#allocation7], 6144  }
  0x48   :  { %1578 = vsyncadd [#allocation7], 4294961152 }
  0x49   :  { %1579 = dma.done.wait [#allocation10], 1024  }
  0x4a   :  { %1580 = vsyncadd [#allocation10], 4294966272  ;;  %v1393_v0 = vld [vmem:[#allocation6 + $0x40] sm:$0xff]   ;;  %v1395_v2 = vld [vmem:[#allocation6 + $0x48] sm:$0xff]  }
  0x4b   :  { %v1394_v1 = vld [vmem:[#allocation6] sm:$0xff]   ;;  %1184 = vmatprep.subr.bf16.mxu0 %v1393_v0  ;;  %1368 = vmatprep.subr.bf16.mxu1 %v1393_v0  ;;  %v1396_v3 = vld [vmem:[#allocation6 + $0x8] sm:$0xff]   ;;  %v1397_v4 = vld [vmem:[#allocation6 + $0x50] sm:$0xff]  }
  0x4c   :  { %1185 = vmatpush3.bf16.msra.mxu0 %v1394_v1  ;;  %1376 = vmatpush3.bf16.msra.mxu1 %v1394_v1  ;;  %v1398_v5 = vld [vmem:[#allocation6 + $0x10] sm:$0xff]   ;;  %v1399_v6 = vld [vmem:[#allocation6 + $0x58] sm:$0xff]   ;;  %v1401_v8 = vld [vmem:[#allocation6 + $0x60] sm:$0xff]  }
  0x4d   :  { %1186 = vmatprep.subr.bf16.mxu0 %v1395_v2  ;;  %1369 = vmatprep.subr.bf16.mxu1 %v1395_v2  ;;  %v1400_v7 = vld [vmem:[#allocation6 + $0x18] sm:$0xff]   ;;  %v1402_v9 = vld [vmem:[#allocation6 + $0x20] sm:$0xff]   ;;  %v1403_v10 = vld [vmem:[#allocation6 + $0x68] sm:$0xff]  }
  0x4e   :  { %v1411_v11 = vld [vmem:[#allocation3 + $0x4] ss:$8 sps:$4 sm:$0xff]   ;;  %v1405_v13 = vld [vmem:[#allocation6 + $0x70] sm:$0xff]   ;;  %v1407_v15 = vld [vmem:[#allocation6 + $0x78] sm:$0xff]  }
  0x4f   :  { %v1404_v12 = vld [vmem:[#allocation6 + $0x28] sm:$0xff]   ;;  %502 = vmatprep.mubr.bf16.mxu0 %v1411_v11  ;;  %v1406_v14 = vld [vmem:[#allocation6 + $0x30] sm:$0xff]   ;;  %v1408_v16 = vld [vmem:[#allocation6 + $0x38] sm:$0xff]  }
  0x50   :  { %1187 = vmatpush3.bf16.msra.mxu0 %v1396_v3  ;;  %1377 = vmatpush3.bf16.msra.mxu1 %v1396_v3  ;;  %v1409_v17 = vld [vmem:[#allocation3] ss:$8 sps:$4 sm:$0xff]   ;;  %v1441_v18 = vld [vmem:[#allocation3 + $0xc4] ss:$8 sps:$4 sm:$0xff]   ;;  %v1412_v19 = vld [vmem:[#allocation3 + $0x14] ss:$8 sps:$4 sm:$0xff]  }
  0x51   :  { %1188 = vmatprep.subr.bf16.mxu0 %v1397_v4  ;;  %1370 = vmatprep.subr.bf16.mxu1 %v1397_v4  ;;  %v1439_v20 = vld [vmem:[#allocation3 + $0xc0] ss:$8 sps:$4 sm:$0xff]   ;;  %v1445_v21 = vld [vmem:[#allocation3 + $0xd4] ss:$8 sps:$4 sm:$0xff]   ;;  %v1414_v22 = vld [vmem:[#allocation3 + $0x10] ss:$8 sps:$4 sm:$0xff]  }
  0x52   :  { %598 = vmatprep.mubr.bf16.mxu1 %v1441_v18  ;;  %v1415_v23 = vld [vmem:[#allocation3 + $0x24] ss:$8 sps:$4 sm:$0xff]   ;;  %v1447_v24 = vld [vmem:[#allocation3 + $0xd0] ss:$8 sps:$4 sm:$0xff]   ;;  %v1417_v29 = vld [vmem:[#allocation3 + $0x20] ss:$8 sps:$4 sm:$0xff]  }
  0x53   :  { %v1457_v25 = vld [vmem:[#allocation9] sm:$0xff]   ;;  %v1458_v26 = vld [vmem:[#allocation9 + $0x8] sm:$0xff]   ;;  %v1459_v28 = vld [vmem:[#allocation9 + $0x10] sm:$0xff]  }
  0x54   :  { %1189 = vmatpush3.bf16.msra.mxu0 %v1398_v5  ;;  %1378 = vmatpush3.bf16.msra.mxu1 %v1398_v5  ;;  %v1451_v27 = vld [vmem:[#allocation3 + $0xe4] ss:$8 sps:$4 sm:$0xff]   ;;  %v1460_v30 = vld [vmem:[#allocation9 + $0x18] sm:$0xff]   ;;  %v1453_v32 = vld [vmem:[#allocation3 + $0xe0] ss:$8 sps:$4 sm:$0xff]  }
  0x55   :  { %1190 = vmatprep.subr.bf16.mxu0 %v1399_v6  ;;  %1371 = vmatprep.subr.bf16.mxu1 %v1399_v6  ;;  %v1418_v31 = vld [vmem:[#allocation3 + $0x34] ss:$8 sps:$4 sm:$0xff]   ;;  %v1420_v34 = vld [vmem:[#allocation3 + $0x30] ss:$8 sps:$4 sm:$0xff]   ;;  %v1421_v35 = vld [vmem:[#allocation3 + $0x44] ss:$8 sps:$4 sm:$0xff]  }
  0x56   :  { %v1454_v33 = vld [vmem:[#allocation3 + $0xf4] ss:$8 sps:$4 sm:$0xff]   ;;  %v1456_v36 = vld [vmem:[#allocation3 + $0xf0] ss:$8 sps:$4 sm:$0xff]   ;;  %v1423_v37 = vld [vmem:[#allocation3 + $0x40] ss:$8 sps:$4 sm:$0xff]  }
  0x57   :  { %v1424_v38 = vld [vmem:[#allocation3 + $0x54] ss:$8 sps:$4 sm:$0xff]   ;;  %v1426_v39 = vld [vmem:[#allocation3 + $0x50] ss:$8 sps:$4 sm:$0xff]   ;;  %v1427_v40 = vld [vmem:[#allocation3 + $0x64] ss:$8 sps:$4 sm:$0xff]  }
  0x58   :  { %1191 = vmatpush3.bf16.msra.mxu0 %v1400_v7  ;;  %1379 = vmatpush3.bf16.msra.mxu1 %v1400_v7  ;;  %v1429_v41 = vld [vmem:[#allocation3 + $0x60] ss:$8 sps:$4 sm:$0xff]   ;;  %v1430_v42 = vld [vmem:[#allocation3 + $0x74] ss:$8 sps:$4 sm:$0xff]   ;;  %v1432_v43 = vld [vmem:[#allocation3 + $0x70] ss:$8 sps:$4 sm:$0xff]  }
  0x59   :  { %1192 = vmatprep.subr.bf16.mxu0 %v1401_v8  ;;  %1372 = vmatprep.subr.bf16.mxu1 %v1401_v8  ;;  %v1433_v44 = vld [vmem:[#allocation3 + $0x84] ss:$8 sps:$4 sm:$0xff]   ;;  %v1435_v45 = vld [vmem:[#allocation3 + $0x80] ss:$8 sps:$4 sm:$0xff]   ;;  %v1436_v46 = vld [vmem:[#allocation3 + $0x94] ss:$8 sps:$4 sm:$0xff]  }
  0x5a   :  { %v1438_v47 = vld [vmem:[#allocation3 + $0x90] ss:$8 sps:$4 sm:$0xff]   ;;  %v1442_v48 = vld [vmem:[#allocation3 + $0xa4] ss:$8 sps:$4 sm:$0xff]   ;;  %v1444_v49 = vld [vmem:[#allocation3 + $0xa0] ss:$8 sps:$4 sm:$0xff]  }
  0x5b   :  { %v1448_v50 = vld [vmem:[#allocation3 + $0xb4] ss:$8 sps:$4 sm:$0xff]   ;;  %v1461_v51 = vld [vmem:[#allocation9 + $0x20] sm:$0xff]   ;;  %v1450_v52 = vld [vmem:[#allocation3 + $0xb0] ss:$8 sps:$4 sm:$0xff]  }
  0x5c   :  { %1193 = vmatpush3.bf16.msra.mxu0 %v1402_v9  ;;  %1380 = vmatpush3.bf16.msra.mxu1 %v1402_v9  ;;  %v1462_v53 = vld [vmem:[#allocation9 + $0x28] sm:$0xff]   ;;  %v1463_v54 = vld [vmem:[#allocation9 + $0x30] sm:$0xff]   ;;  %v1464_v55 = vld [vmem:[#allocation9 + $0x38] sm:$0xff]  }
  0x5d   :  { %1194 = vmatprep.subr.bf16.mxu0 %v1403_v10  ;;  %1373 = vmatprep.subr.bf16.mxu1 %v1403_v10  ;;  %v722_v62 = vld [vmem:[#allocation8 + $0xc0] sm:$0xff]  ;;  %v699_v1 = vld [vmem:[#allocation8 + $0x8] sm:$0xff] }
  0x5e   :  { %v698_v63 = vld [vmem:[#allocation8] sm:$0xff]  ;;  %v723_v6 = vld [vmem:[#allocation8 + $0xc8] sm:$0xff] }
  0x60   :  { %1195 = vmatpush3.bf16.msra.mxu0 %v1404_v12  ;;  %1381 = vmatpush3.bf16.msra.mxu1 %v1404_v12 }
  0x61   :  { %1196 = vmatprep.subr.bf16.mxu0 %v1405_v13  ;;  %1374 = vmatprep.subr.bf16.mxu1 %v1405_v13 }
  0x64   :  { %1197 = vmatpush3.bf16.msra.mxu0 %v1406_v14  ;;  %1382 = vmatpush3.bf16.msra.mxu1 %v1406_v14 }
  0x65   :  { %1198 = vmatprep.subr.bf16.mxu0 %v1407_v15  ;;  %1375 = vmatprep.subr.bf16.mxu1 %v1407_v15 }
  0x68   :  { %1199 = vmatpush3.bf16.msra.mxu0 %v1408_v16  ;;  %1383 = vmatpush3.bf16.msra.mxu1 %v1408_v16 }
  0x69   :  { %1320 = vmatprep.subr.bf16.mxu1 %v1457_v25 }
  0x6b   :  { %503 = vmatmul.mubr.bf16.vlgmr.msra.gmra.mrb[0].mxu0 %v1409_v17  ;;  %599 = vmatmul.mubr.bf16.vlgmr.msra.gmra.mrb[0].mxu1 %v1439_v20  ;;  %v724_v20 = vld [vmem:[#allocation8 + $0xd0] sm:$0xff] }
  0x6c   :  { %510 = vmatprep.mubr.bf16.mxu0 %v1412_v19  ;;  %606 = vmatprep.mubr.bf16.mxu1 %v1445_v21  ;;  %v700_v21 = vld [vmem:[#allocation8 + $0x10] sm:$0xff] }
  0x6d   :  { %1321 = vmatpush3.bf16.msra.mxu1 %v1457_v25 }
  0x6e   :  { %1322 = vmatprep.subr.bf16.mxu1 %v1458_v26 }
  0x71   :  { %1323 = vmatpush3.bf16.msra.mxu1 %v1458_v26 }
  0x72   :  { %1324 = vmatprep.subr.bf16.mxu1 %v1459_v28 }
  0x73   :  { %511 = vmatmul.mubr.bf16.gmra.mrb[4].mxu0 %v1414_v22  ;;  %607 = vmatmul.mubr.bf16.gmra.mrb[4].mxu1 %v1447_v24 }
  0x74   :  { %518 = vmatprep.mubr.bf16.mxu0 %v1415_v23  ;;  %614 = vmatprep.mubr.bf16.mxu1 %v1451_v27  ;;  %v701_v23 = vld [vmem:[#allocation8 + $0x18] sm:$0xff] }
  0x75   :  { %1325 = vmatpush3.bf16.msra.mxu1 %v1459_v28  ;;  %v725_v28 = vld [vmem:[#allocation8 + $0xd8] sm:$0xff] }
  0x76   :  { %1326 = vmatprep.subr.bf16.mxu1 %v1460_v30 }
  0x79   :  { %1327 = vmatpush3.bf16.msra.mxu1 %v1460_v30 }
  0x7a   :  { %1328 = vmatprep.subr.bf16.mxu1 %v1461_v51 }
  0x7b   :  { %519 = vmatmul.mubr.bf16.gmra.mrb[8].mxu0 %v1417_v29  ;;  %615 = vmatmul.mubr.bf16.gmra.mrb[8].mxu1 %v1453_v32 }
  0x7c   :  { %526 = vmatprep.mubr.bf16.mxu0 %v1418_v31  ;;  %622 = vmatprep.mubr.bf16.mxu1 %v1454_v33 }
  0x7d   :  { %1329 = vmatpush3.bf16.msra.mxu1 %v1461_v51 }
  0x7e   :  { %1330 = vmatprep.subr.bf16.mxu1 %v1462_v53 }
  0x81   :  { %1331 = vmatpush3.bf16.msra.mxu1 %v1462_v53 }
  0x82   :  { %1332 = vmatprep.subr.bf16.mxu1 %v1463_v54 }
  0x83   :  { %527 = vmatmul.mubr.bf16.gmra.mrb[12].mxu0 %v1420_v34  ;;  %623 = vmatmul.mubr.bf16.gmra.mrb[12].mxu1 %v1456_v36 }
  0x84   :  { %534 = vmatprep.mubr.bf16.mxu0 %v1421_v35 }
  0x85   :  { %1333 = vmatpush3.bf16.msra.mxu1 %v1463_v54 }
  0x86   :  { %1334 = vmatprep.subr.bf16.mxu1 %v1464_v55 }
  0x89   :  { %1335 = vmatpush3.bf16.msra.mxu1 %v1464_v55 }
  0x8b   :  { %535 = vmatmul.mubr.bf16.gmra.mrb[16].mxu0 %v1423_v37 }
  0x8c   :  { %542 = vmatprep.mubr.bf16.mxu0 %v1424_v38 }
  0x93   :  { %543 = vmatmul.mubr.bf16.gmra.mrb[20].mxu0 %v1426_v39 }
  0x94   :  { %550 = vmatprep.mubr.bf16.mxu0 %v1427_v40 }
  0x9b   :  { %551 = vmatmul.mubr.bf16.gmra.mrb[24].mxu0 %v1429_v41 }
  0x9c   :  { %558 = vmatprep.mubr.bf16.mxu0 %v1430_v42  ;;  %v726_v42 = vld [vmem:[#allocation8 + $0xe0] sm:$0xff] }
  0xa3   :  { %559 = vmatmul.mubr.bf16.gmra.mrb[28].mxu0 %v1432_v43  ;;  %v702_v43 = vld [vmem:[#allocation8 + $0x20] sm:$0xff] }
  0xa4   :  { %566 = vmatprep.mubr.bf16.mxu0 %v1433_v44 }
  0xab   :  { %567 = vmatmul.mubr.bf16.gmra.mrb[32].mxu0 %v1435_v45  ;;  %v703_v45 = vld [vmem:[#allocation8 + $0x28] sm:$0xff] }
  0xac   :  { %574 = vmatprep.mubr.bf16.mxu0 %v1436_v46 }
  0xb3   :  { %575 = vmatmul.mubr.bf16.gmra.mrb[36].mxu0 %v1438_v47 }
  0xb4   :  { %582 = vmatprep.mubr.bf16.mxu0 %v1442_v48 }
  0xbb   :  { %583 = vmatmul.mubr.bf16.gmra.mrb[40].mxu0 %v1444_v49 }
  0xbc   :  { %590 = vmatprep.mubr.bf16.mxu0 %v1448_v50  ;;  %v727_v50 = vld [vmem:[#allocation8 + $0xe8] sm:$0xff] }
  0xc3   :  { %591 = vmatmul.mubr.bf16.gmra.mrb[44].mxu0 %v1450_v52 }
 0x13e   :  { %v1200_v56 = vpop.f32.mrb[0].mxu0  ;;  %v1272_v58 = vpop.f32.mrb[0].mxu1 }
 0x13f   :  { %v1201_v57 = vpop.f32.mrb[1].mxu0  ;;  %v1273_v61 = vpop.f32.mrb[1].mxu1 }
 0x140   :  { %v1202_v59 = vadd.f32 %v1201_v57, %v1200_v56  ;;  %v1203_v60 = vpop.f32.mrb[2].mxu0  ;;  %v1274_v2 = vadd.f32 %v1273_v61, %v1272_v58  ;;  %v1275_v3 = vpop.f32.mrb[2].mxu1 }
 0x141   :  { %v1204_v0 = vpop.f32.mrb[3].mxu0  ;;  %v1276_v5 = vpop.f32.mrb[3].mxu1 }
 0x142   :  { %v1205_v4 = vadd.f32 %v1204_v0, %v1203_v60  ;;  %v1689_v7 = vadd.f32 %v1274_v2, %v722_v62  ;;  %v1277_v8 = vadd.f32 %v1276_v5, %v1275_v3  ;;  %v762_v9 = vadd.f32 %v1202_v59, %v698_v63  ;;  %v728_v0 = vld [vmem:[#allocation8 + $0xf0] sm:$0xff]  ;;  %v705_v3 = vld [vmem:[#allocation8 + $0x38] sm:$0xff] }
 0x144   :  { %v763_v10 = vadd.f32 %v1205_v4, %v699_v1  ;;  %v1691_v11 = vadd.f32 %v1277_v8, %v723_v6  ;;  %v704_v1 = vld [vmem:[#allocation8 + $0x30] sm:$0xff] }
 0x146   :  { %v1206_v12 = vpop.f32.mrb[4].mxu0  ;;  %v794_v13 = vpack.c.bf16 %v763_v10, %v762_v9  ;;  %v1278_v15 = vpop.f32.mrb[4].mxu1  ;;  %v806_v16 = vpack.c.bf16 %v1691_v11, %v1689_v7  ;;  %v729_v9 = vld [vmem:[#allocation8 + $0xf8] sm:$0xff] }
 0x147   :  { %v1207_v14 = vpop.f32.mrb[5].mxu0  ;;  %v1279_v19 = vpop.f32.mrb[5].mxu1 }
 0x148   :  { %v1208_v17 = vadd.f32 %v1207_v14, %v1206_v12  ;;  %v1209_v18 = vpop.f32.mrb[6].mxu0  ;;  %1336 = vmatprep.mubr.bf16.mxu1 %v794_v13  ;;  %v1280_v24 = vadd.f32 %v1279_v19, %v1278_v15  ;;  %v1281_v25 = vpop.f32.mrb[6].mxu1 }
 0x149   :  { %v1210_v22 = vpop.f32.mrb[7].mxu0  ;;  %v1282_v27 = vpop.f32.mrb[7].mxu1 }
 0x14a   :  { %v1211_v26 = vadd.f32 %v1210_v22, %v1209_v18  ;;  %v1695_v29 = vadd.f32 %v1280_v24, %v724_v20  ;;  %v1283_v30 = vadd.f32 %v1282_v27, %v1281_v25  ;;  %v764_v31 = vadd.f32 %v1208_v17, %v700_v21  ;;  %v707_v25 = vld [vmem:[#allocation8 + $0x48] sm:$0xff] }
 0x14c   :  { %v765_v32 = vadd.f32 %v1211_v26, %v701_v23  ;;  %v1697_v33 = vadd.f32 %v1283_v30, %v725_v28  ;;  %v706_v23 = vld [vmem:[#allocation8 + $0x40] sm:$0xff] }
 0x14e   :  { %v795_v34 = vpack.c.bf16 %v765_v32, %v764_v31  ;;  %v1212_v35 = vpop.f32.mrb[8].mxu0  ;;  %v1284_v37 = vpop.f32.mrb[8].mxu1  ;;  %v807_v38 = vpack.c.bf16 %v1697_v33, %v1695_v29 }
 0x14f   :  { %v1213_v36 = vpop.f32.mrb[9].mxu0  ;;  %v1285_v41 = vpop.f32.mrb[9].mxu1 }
 0x150   :  { %v1214_v39 = vadd.f32 %v1213_v36, %v1212_v35  ;;  %v1215_v40 = vpop.f32.mrb[10].mxu0  ;;  %1337 = vmatmul.mubr.bf16.vlgmr.msra.gmra.mrb[16].mxu1 %v795_v34  ;;  %v1286_v46 = vadd.f32 %v1285_v41, %v1284_v37  ;;  %v1287_v47 = vpop.f32.mrb[10].mxu1  ;;  %v708_v36 = vld [vmem:[#allocation8 + $0x50] sm:$0xff] }
 0x151   :  { %v1216_v44 = vpop.f32.mrb[11].mxu0  ;;  %v1288_v49 = vpop.f32.mrb[11].mxu1 }
 0x152   :  { %v1217_v48 = vadd.f32 %v1216_v44, %v1215_v40  ;;  %v1701_v51 = vadd.f32 %v1286_v46, %v726_v42  ;;  %v1289_v52 = vadd.f32 %v1288_v49, %v1287_v47  ;;  %v766_v53 = vadd.f32 %v1214_v39, %v702_v43  ;;  %v709_v39 = vld [vmem:[#allocation8 + $0x58] sm:$0xff] }
 0x154   :  { %v767_v54 = vadd.f32 %v1217_v48, %v703_v45  ;;  %v1703_v55 = vadd.f32 %v1289_v52, %v727_v50  ;;  %v710_v48 = vld [vmem:[#allocation8 + $0x60] sm:$0xff]  ;;  %v711_v50 = vld [vmem:[#allocation8 + $0x68] sm:$0xff] }
 0x156   :  { %v1218_v56 = vpop.f32.mrb[12].mxu0  ;;  %v796_v57 = vpack.c.bf16 %v767_v54, %v766_v53  ;;  %v1290_v59 = vpop.f32.mrb[12].mxu1  ;;  %v808_v60 = vpack.c.bf16 %v1703_v55, %v1701_v51 }
 0x157   :  { %v1219_v58 = vpop.f32.mrb[13].mxu0  ;;  %v1291_v63 = vpop.f32.mrb[13].mxu1 }
 0x158   :  { %v1220_v61 = vadd.f32 %v1219_v58, %v1218_v56  ;;  %v1221_v62 = vpop.f32.mrb[14].mxu0  ;;  %1340 = vmatprep.mubr.bf16.mxu1 %v796_v57  ;;  %v1292_v4 = vadd.f32 %v1291_v63, %v1290_v59  ;;  %v1293_v5 = vpop.f32.mrb[14].mxu1 }
 0x159   :  { %v1222_v2 = vpop.f32.mrb[15].mxu0  ;;  %v1294_v8 = vpop.f32.mrb[15].mxu1 }
 0x15a   :  { %v1223_v6 = vadd.f32 %v1222_v2, %v1221_v62  ;;  %v1707_v10 = vadd.f32 %v1292_v4, %v728_v0  ;;  %v1295_v12 = vadd.f32 %v1294_v8, %v1293_v5  ;;  %v768_v13 = vadd.f32 %v1220_v61, %v704_v1  ;;  %v712_v62 = vld [vmem:[#allocation8 + $0x70] sm:$0xff]  ;;  %v713_v0 = vld [vmem:[#allocation8 + $0x78] sm:$0xff] }
 0x15c   :  { %v769_v14 = vadd.f32 %v1223_v6, %v705_v3  ;;  %v1709_v15 = vadd.f32 %v1295_v12, %v729_v9  ;;  %v714_v12 = vld [vmem:[#allocation8 + $0x80] sm:$0xff] }
 0x15e   :  { %v1224_v17 = vpop.f32.mrb[16].mxu0  ;;  %v797_v18 = vpack.c.bf16 %v769_v14, %v768_v13  ;;  %v809_v20 = vpack.c.bf16 %v1709_v15, %v1707_v10  ;;  %v715_v14 = vld [vmem:[#allocation8 + $0x88] sm:$0xff] }
 0x15f   :  { %v1225_v19 = vpop.f32.mrb[17].mxu0 }
 0x160   :  { %v1226_v21 = vadd.f32 %v1225_v19, %v1224_v17  ;;  %v1227_v22 = vpop.f32.mrb[18].mxu0  ;;  %1341 = vmatmul.mubr.bf16.gmra.mrb[20].mxu1 %v797_v18 }
 0x161   :  { %v1228_v24 = vpop.f32.mrb[19].mxu0 }
 0x162   :  { %v1229_v26 = vadd.f32 %v1228_v24, %v1227_v22  ;;  %v770_v27 = vadd.f32 %v1226_v21, %v706_v23 }
 0x164   :  { %v771_v28 = vadd.f32 %v1229_v26, %v707_v25  ;;  %v716_v26 = vld [vmem:[#allocation8 + $0x90] sm:$0xff] }
 0x166   :  { %v1230_v30 = vpop.f32.mrb[20].mxu0  ;;  %v798_v31 = vpack.c.bf16 %v771_v28, %v770_v27  ;;  %v717_v28 = vld [vmem:[#allocation8 + $0x98] sm:$0xff] }
 0x167   :  { %v1231_v32 = vpop.f32.mrb[21].mxu0 }
 0x168   :  { %v1232_v34 = vadd.f32 %v1231_v32, %v1230_v30  ;;  %v1233_v35 = vpop.f32.mrb[22].mxu0  ;;  %1344 = vmatprep.mubr.bf16.mxu1 %v798_v31 }
 0x169   :  { %v1234_v37 = vpop.f32.mrb[23].mxu0 }
 0x16a   :  { %v1235_v40 = vadd.f32 %v1234_v37, %v1233_v35  ;;  %v772_v41 = vadd.f32 %v1232_v34, %v708_v36 }
 0x16c   :  { %v773_v42 = vadd.f32 %v1235_v40, %v709_v39  ;;  %v718_v40 = vld [vmem:[#allocation8 + $0xa0] sm:$0xff] }
 0x16e   :  { %v1236_v43 = vpop.f32.mrb[24].mxu0  ;;  %v799_v44 = vpack.c.bf16 %v773_v42, %v772_v41  ;;  %v719_v42 = vld [vmem:[#allocation8 + $0xa8] sm:$0xff] }
 0x16f   :  { %v1237_v45 = vpop.f32.mrb[25].mxu0 }
 0x170   :  { %v1238_v46 = vadd.f32 %v1237_v45, %v1236_v43  ;;  %v1239_v47 = vpop.f32.mrb[26].mxu0  ;;  %1345 = vmatmul.mubr.bf16.gmra.mrb[24].mxu1 %v799_v44 }
 0x171   :  { %v1240_v49 = vpop.f32.mrb[27].mxu0 }
 0x172   :  { %v1241_v52 = vadd.f32 %v1240_v49, %v1239_v47  ;;  %v774_v53 = vadd.f32 %v1238_v46, %v710_v48 }
 0x174   :  { %v775_v54 = vadd.f32 %v1241_v52, %v711_v50  ;;  %v720_v52 = vld [vmem:[#allocation8 + $0xb0] sm:$0xff] }
 0x176   :  { %v1242_v56 = vpop.f32.mrb[28].mxu0  ;;  %v800_v57 = vpack.c.bf16 %v775_v54, %v774_v53  ;;  %v721_v54 = vld [vmem:[#allocation8 + $0xb8] sm:$0xff] }
 0x177   :  { %v1243_v58 = vpop.f32.mrb[29].mxu0 }
 0x178   :  { %v1244_v59 = vadd.f32 %v1243_v58, %v1242_v56  ;;  %v1245_v61 = vpop.f32.mrb[30].mxu0  ;;  %1348 = vmatprep.mubr.bf16.mxu1 %v800_v57 }
 0x179   :  { %v1246_v63 = vpop.f32.mrb[31].mxu0 }
 0x17a   :  { %v1247_v1 = vadd.f32 %v1246_v63, %v1245_v61  ;;  %v776_v2 = vadd.f32 %v1244_v59, %v712_v62  ;;  %v1728_v61 = vld [vmem:[%s1781_s4] ss:$0 sm:$0xff]  ;;  %s1591_s4 = smov [#allocation11]  }
 0x17b   :  { %s1111_s29 = sshll.u32 %s1591_s4, 4  ;;  %s1112_s29 = int_to_ptr.vmem [resolvable:$true] %s1111_s29 }
 0x17c   :  { %v777_v3 = vadd.f32 %v1247_v1, %v713_v0  ;;  %s1553_s20 = scalar_lea.vmem %s1112_s29, 4096  ;;  %p1558_p5 = scmp.lt.s32.totalorder %s1112_s29, %s1112_s29 }
 0x17d   :  { %p1554_p4 = scmp.ne.s32.totalorder %s1112_s29, %s1553_s20  ;;  %p1559_p6 = scmp.lt.s32.totalorder %s1553_s20, %s1553_s20 }
 0x17e   :  { %v1248_v4 = vpop.f32.mrb[32].mxu0  ;;  %v801_v5 = vpack.c.bf16 %v777_v3, %v776_v2 }
 0x17f   :  { %v1249_v6 = vpop.f32.mrb[33].mxu0  ;;  %p1560_p7 = por %p1559_p6, %p1558_p5 }
 0x180   :  { %v1250_v8 = vadd.f32 %v1249_v6, %v1248_v4  ;;  %v1251_v9 = vpop.f32.mrb[34].mxu0  ;;  %1349 = vmatmul.mubr.bf16.gmra.mrb[28].mxu1 %v801_v5 }
 0x181   :  { %v1252_v13 = vpop.f32.mrb[35].mxu0  ;;  %p1561_p8 = pnand %p1560_p7, %p1554_p4 }
 0x182   :  { %v1253_v17 = vadd.f32 %v1252_v13, %v1251_v9  ;;  %v778_v18 = vadd.f32 %v1250_v8, %v714_v12 }
 0x184   :  { %v779_v19 = vadd.f32 %v1253_v17, %v715_v14 }
 0x186   :  { %v1254_v21 = vpop.f32.mrb[36].mxu0  ;;  %v802_v22 = vpack.c.bf16 %v779_v19, %v778_v18 }
 0x187   :  { %v1255_v23 = vpop.f32.mrb[37].mxu0 }
 0x188   :  { %v1256_v24 = vadd.f32 %v1255_v23, %v1254_v21  ;;  %v1257_v25 = vpop.f32.mrb[38].mxu0  ;;  %1352 = vmatprep.mubr.bf16.mxu1 %v802_v22 }
 0x189   :  { %v1258_v27 = vpop.f32.mrb[39].mxu0 }
 0x18a   :  { %v1259_v30 = vadd.f32 %v1258_v27, %v1257_v25  ;;  %v780_v31 = vadd.f32 %v1256_v24, %v716_v26 }
 0x18c   :  { %v781_v32 = vadd.f32 %v1259_v30, %v717_v28 }
 0x18e   :  { %v1260_v34 = vpop.f32.mrb[40].mxu0  ;;  %v803_v35 = vpack.c.bf16 %v781_v32, %v780_v31 }
 0x18f   :  { %v1261_v36 = vpop.f32.mrb[41].mxu0 }
 0x190   :  { %v1262_v37 = vadd.f32 %v1261_v36, %v1260_v34  ;;  %v1263_v39 = vpop.f32.mrb[42].mxu0  ;;  %1353 = vmatmul.mubr.bf16.gmra.mrb[32].mxu1 %v803_v35 }
 0x191   :  { %v1264_v41 = vpop.f32.mrb[43].mxu0 }
 0x192   :  { %v1265_v43 = vadd.f32 %v1264_v41, %v1263_v39  ;;  %v782_v44 = vadd.f32 %v1262_v37, %v718_v40 }
 0x194   :  { %v783_v45 = vadd.f32 %v1265_v43, %v719_v42 }
 0x196   :  { %v1266_v46 = vpop.f32.mrb[44].mxu0  ;;  %v804_v47 = vpack.c.bf16 %v783_v45, %v782_v44 }
 0x197   :  { %v1267_v48 = vpop.f32.mrb[45].mxu0 }
 0x198   :  { %v1268_v49 = vadd.f32 %v1267_v48, %v1266_v46  ;;  %v1269_v50 = vpop.f32.mrb[46].mxu0  ;;  %1356 = vmatprep.mubr.bf16.mxu1 %v804_v47 }
 0x199   :  { %v1270_v53 = vpop.f32.mrb[47].mxu0 }
 0x19a   :  { %v1271_v56 = vadd.f32 %v1270_v53, %v1269_v50  ;;  %v784_v57 = vadd.f32 %v1268_v49, %v720_v52 }
 0x19c   :  { %v785_v58 = vadd.f32 %v1271_v56, %v721_v54 }
 0x19e   :  { %v805_v59 = vpack.c.bf16 %v785_v58, %v784_v57 }
 0x1a0   :  { %1357 = vmatmul.mubr.bf16.gmra.mrb[36].mxu1 %v805_v59 }
 0x1a1   :  { %1360 = vmatprep.mubr.bf16.mxu1 %v806_v16 }
 0x1a8   :  { %1361 = vmatmul.mubr.bf16.gmra.mrb[40].mxu1 %v807_v38 }
 0x1a9   :  { %1364 = vmatprep.mubr.bf16.mxu1 %v808_v60 }
 0x1b0   :  { %1365 = vmatmul.mubr.bf16.gmra.mrb[44].mxu1 %v809_v20 }
 0x223   :  { %v1338_v62 = vpop.f32.mrb[16].mxu1 }
 0x224   :  { %v924_v7 = vadd.f32 %v1338_v62, %v1728_v61  ;;  %v915_v11 = vpop.f32.mrb[17].mxu1 }
 0x225   :  { %v916_v16 = vadd.f32 %v1728_v61, %v915_v11  ;;  %v1339_v29 = vpop.f32.mrb[18].mxu1 }
 0x226   :  { %v1044_v33 = vmax.f32 %v924_v7, 0.0  ;;  %v927_v38 = vadd.f32 %v1339_v29, %v1728_v61  ;;  %v918_v51 = vpop.f32.mrb[19].mxu1 }
 0x227   :  { %v1042_v55 = vmax.f32 %v916_v16, 0.0  ;;  %v919_v60 = vadd.f32 %v1728_v61, %v918_v51 }
 0x228   :  { %1076 = vst [vmem:[#allocation11 + $0x10] sm:$0xff] %v1044_v33  ;;  %v1045_v10 = vmax.f32 %v927_v38, 0.0 }
 0x229   :  { %1074 = vst [vmem:[#allocation11] sm:$0xff] %v1042_v55  ;;  %v1043_v15 = vmax.f32 %v919_v60, 0.0 }
 0x22a   :  { %1077 = vst [vmem:[#allocation11 + $0x18] sm:$0xff] %v1045_v10 }
 0x22b   :  { %1075 = vst [vmem:[#allocation11 + $0x8] sm:$0xff] %v1043_v15 }
 0x233   :  { %v1342_v20 = vpop.f32.mrb[20].mxu1 }
 0x234   :  { %v940_v63 = vadd.f32 %v1342_v20, %v1728_v61  ;;  %v931_v0 = vpop.f32.mrb[21].mxu1 }
 0x235   :  { %v932_v1 = vadd.f32 %v1728_v61, %v931_v0  ;;  %v1343_v2 = vpop.f32.mrb[22].mxu1 }
 0x236   :  { %v1048_v3 = vmax.f32 %v940_v63, 0.0  ;;  %v943_v4 = vadd.f32 %v1343_v2, %v1728_v61  ;;  %v934_v5 = vpop.f32.mrb[23].mxu1 }
 0x237   :  { %v1046_v6 = vmax.f32 %v932_v1, 0.0  ;;  %v935_v8 = vadd.f32 %v1728_v61, %v934_v5 }
 0x238   :  { %1080 = vst [vmem:[#allocation11 + $0x30] sm:$0xff] %v1048_v3  ;;  %v1049_v9 = vmax.f32 %v943_v4, 0.0 }
 0x239   :  { %1078 = vst [vmem:[#allocation11 + $0x20] sm:$0xff] %v1046_v6  ;;  %v1047_v12 = vmax.f32 %v935_v8, 0.0 }
 0x23a   :  { %1081 = vst [vmem:[#allocation11 + $0x38] sm:$0xff] %v1049_v9 }
 0x23b   :  { %1079 = vst [vmem:[#allocation11 + $0x28] sm:$0xff] %v1047_v12 }
 0x243   :  { %v1346_v13 = vpop.f32.mrb[24].mxu1 }
 0x244   :  { %v956_v14 = vadd.f32 %v1346_v13, %v1728_v61  ;;  %v947_v17 = vpop.f32.mrb[25].mxu1 }
 0x245   :  { %v948_v18 = vadd.f32 %v1728_v61, %v947_v17  ;;  %v1347_v19 = vpop.f32.mrb[26].mxu1 }
 0x246   :  { %v1052_v21 = vmax.f32 %v956_v14, 0.0  ;;  %v959_v22 = vadd.f32 %v1347_v19, %v1728_v61  ;;  %v950_v23 = vpop.f32.mrb[27].mxu1 }
 0x247   :  { %v1050_v24 = vmax.f32 %v948_v18, 0.0  ;;  %v951_v25 = vadd.f32 %v1728_v61, %v950_v23 }
 0x248   :  { %1084 = vst [vmem:[#allocation11 + $0x50] sm:$0xff] %v1052_v21  ;;  %v1053_v26 = vmax.f32 %v959_v22, 0.0 }
 0x249   :  { %1082 = vst [vmem:[#allocation11 + $0x40] sm:$0xff] %v1050_v24  ;;  %v1051_v27 = vmax.f32 %v951_v25, 0.0 }
 0x24a   :  { %1085 = vst [vmem:[#allocation11 + $0x58] sm:$0xff] %v1053_v26 }
 0x24b   :  { %1083 = vst [vmem:[#allocation11 + $0x48] sm:$0xff] %v1051_v27 }
 0x253   :  { %v1350_v28 = vpop.f32.mrb[28].mxu1 }
 0x254   :  { %v972_v30 = vadd.f32 %v1350_v28, %v1728_v61  ;;  %v963_v31 = vpop.f32.mrb[29].mxu1 }
 0x255   :  { %v964_v32 = vadd.f32 %v1728_v61, %v963_v31  ;;  %v1351_v34 = vpop.f32.mrb[30].mxu1 }
 0x256   :  { %v1056_v35 = vmax.f32 %v972_v30, 0.0  ;;  %v975_v36 = vadd.f32 %v1351_v34, %v1728_v61  ;;  %v966_v37 = vpop.f32.mrb[31].mxu1 }
 0x257   :  { %v1054_v39 = vmax.f32 %v964_v32, 0.0  ;;  %v967_v40 = vadd.f32 %v1728_v61, %v966_v37 }
 0x258   :  { %1088 = vst [vmem:[#allocation11 + $0x70] sm:$0xff] %v1056_v35  ;;  %v1057_v41 = vmax.f32 %v975_v36, 0.0 }
 0x259   :  { %1086 = vst [vmem:[#allocation11 + $0x60] sm:$0xff] %v1054_v39  ;;  %v1055_v42 = vmax.f32 %v967_v40, 0.0 }
 0x25a   :  { %1089 = vst [vmem:[#allocation11 + $0x78] sm:$0xff] %v1057_v41 }
 0x25b   :  { %1087 = vst [vmem:[#allocation11 + $0x68] sm:$0xff] %v1055_v42 }
 0x263   :  { %v1354_v43 = vpop.f32.mrb[32].mxu1 }
 0x264   :  { %v988_v44 = vadd.f32 %v1354_v43, %v1728_v61  ;;  %v979_v45 = vpop.f32.mrb[33].mxu1 }
 0x265   :  { %v980_v46 = vadd.f32 %v1728_v61, %v979_v45  ;;  %v1355_v47 = vpop.f32.mrb[34].mxu1 }
 0x266   :  { %v1060_v48 = vmax.f32 %v988_v44, 0.0  ;;  %v991_v49 = vadd.f32 %v1355_v47, %v1728_v61  ;;  %v982_v50 = vpop.f32.mrb[35].mxu1 }
 0x267   :  { %v1058_v52 = vmax.f32 %v980_v46, 0.0  ;;  %v983_v53 = vadd.f32 %v1728_v61, %v982_v50 }
 0x268   :  { %1092 = vst [vmem:[#allocation11 + $0x90] sm:$0xff] %v1060_v48  ;;  %v1061_v54 = vmax.f32 %v991_v49, 0.0 }
 0x269   :  { %1090 = vst [vmem:[#allocation11 + $0x80] sm:$0xff] %v1058_v52  ;;  %v1059_v56 = vmax.f32 %v983_v53, 0.0 }
 0x26a   :  { %1093 = vst [vmem:[#allocation11 + $0x98] sm:$0xff] %v1061_v54 }
 0x26b   :  { %1091 = vst [vmem:[#allocation11 + $0x88] sm:$0xff] %v1059_v56 }
 0x273   :  { %v1358_v57 = vpop.f32.mrb[36].mxu1 }
 0x274   :  { %v1004_v58 = vadd.f32 %v1358_v57, %v1728_v61  ;;  %v995_v59 = vpop.f32.mrb[37].mxu1 }
 0x275   :  { %v996_v62 = vadd.f32 %v1728_v61, %v995_v59  ;;  %v1359_v7 = vpop.f32.mrb[38].mxu1 }
 0x276   :  { %v1064_v11 = vmax.f32 %v1004_v58, 0.0  ;;  %v1007_v16 = vadd.f32 %v1359_v7, %v1728_v61  ;;  %v998_v29 = vpop.f32.mrb[39].mxu1 }
 0x277   :  { %v1062_v33 = vmax.f32 %v996_v62, 0.0  ;;  %v999_v38 = vadd.f32 %v1728_v61, %v998_v29 }
 0x278   :  { %1096 = vst [vmem:[#allocation11 + $0xb0] sm:$0xff] %v1064_v11  ;;  %v1065_v51 = vmax.f32 %v1007_v16, 0.0 }
 0x279   :  { %1094 = vst [vmem:[#allocation11 + $0xa0] sm:$0xff] %v1062_v33  ;;  %v1063_v55 = vmax.f32 %v999_v38, 0.0 }
 0x27a   :  { %1097 = vst [vmem:[#allocation11 + $0xb8] sm:$0xff] %v1065_v51 }
 0x27b   :  { %1095 = vst [vmem:[#allocation11 + $0xa8] sm:$0xff] %v1063_v55  ;;  %v1362_v60 = vpop.f32.mrb[40].mxu1 }
 0x27c   :  { %v1020_v10 = vadd.f32 %v1362_v60, %v1728_v61  ;;  %v1011_v15 = vpop.f32.mrb[41].mxu1 }
 0x27d   :  { %v1012_v20 = vadd.f32 %v1728_v61, %v1011_v15  ;;  %v1363_v63 = vpop.f32.mrb[42].mxu1 }
 0x27e   :  { %v1068_v0 = vmax.f32 %v1020_v10, 0.0  ;;  %v1023_v1 = vadd.f32 %v1363_v63, %v1728_v61  ;;  %v1014_v2 = vpop.f32.mrb[43].mxu1 }
 0x27f   :  { %v1066_v3 = vmax.f32 %v1012_v20, 0.0  ;;  %v1015_v4 = vadd.f32 %v1728_v61, %v1014_v2 }
 0x280   :  { %1100 = vst [vmem:[#allocation11 + $0xd0] sm:$0xff] %v1068_v0  ;;  %v1069_v5 = vmax.f32 %v1023_v1, 0.0 }
 0x281   :  { %1098 = vst [vmem:[#allocation11 + $0xc0] sm:$0xff] %v1066_v3  ;;  %v1067_v6 = vmax.f32 %v1015_v4, 0.0 }
 0x282   :  { %1101 = vst [vmem:[#allocation11 + $0xd8] sm:$0xff] %v1069_v5 }
 0x283   :  { %1099 = vst [vmem:[#allocation11 + $0xc8] sm:$0xff] %v1067_v6  ;;  %v1366_v8 = vpop.f32.mrb[44].mxu1 }
 0x284   :  { %v1036_v9 = vadd.f32 %v1366_v8, %v1728_v61  ;;  %v1027_v12 = vpop.f32.mrb[45].mxu1 }
 0x285   :  { %v1028_v13 = vadd.f32 %v1728_v61, %v1027_v12  ;;  %v1367_v14 = vpop.f32.mrb[46].mxu1 }
 0x286   :  { %v1072_v17 = vmax.f32 %v1036_v9, 0.0  ;;  %v1039_v18 = vadd.f32 %v1367_v14, %v1728_v61  ;;  %v1030_v19 = vpop.f32.mrb[47].mxu1 }
 0x287   :  { %v1070_v21 = vmax.f32 %v1028_v13, 0.0  ;;  %v1031_v22 = vadd.f32 %v1728_v61, %v1030_v19 }
 0x288   :  { %1104 = vst [vmem:[#allocation11 + $0xf0] sm:$0xff] %v1072_v17  ;;  %v1073_v23 = vmax.f32 %v1039_v18, 0.0 }
 0x289   :  { %1102 = vst [vmem:[#allocation11 + $0xe0] sm:$0xff] %v1070_v21  ;;  %v1071_v24 = vmax.f32 %v1031_v22, 0.0 }
 0x28a   :  { %1105 = vst [vmem:[#allocation11 + $0xf8] sm:$0xff] %v1073_v23 }
 0x28b   :  { %1103 = vst [vmem:[#allocation11 + $0xe8] sm:$0xff] %v1071_v24 }
 0x28c   :  { %1564 = shalt.err (!%p1561_p8)
}
 0x28d   :  { %s1565_s23 = scalar_lea.hbm %s1782_s5, 4096 }
 0x28e   :  { %p1566_p9 = scmp.ne.s32.totalorder %s1782_s5, %s1565_s23  ;;  %p1569_p10 = scmp.lt.u32.totalorder %s1565_s23, %s1782_s5 }
 0x290   :  { %p1571_p11 = pnand %p1569_p10, %p1566_p9 }
 0x292   :  { %1574 = shalt.err (!%p1571_p11)
}
 0x293   :  { %1117 = dma.vmem_to_hbm [thread:$0]  %s1112_s29, 4096, %s1782_s5, [#allocation5], %s1587_s1, %s1587_s1, %s1588_s17  }
 0x294   :  { %1581 = dma.done.wait [#allocation5], 4096  }
 0x295   :  { %1582 = vsyncadd [#allocation5], 4294963200 }
 0x296   :  { %1121 = vsyncpa [#allocation4], 1 }
 0x297   :  { %1122 = vsyncpa [#allocation7], 1 }
 0x298   :  { %1123 = vsyncpa [#allocation10], 1 }
 0x299   :  { %1124 = vsyncpa [#allocation5], 1 }

</bundles_post_ra>
